<compile_context>
chip_gen: v6e
topology: v6e:2x2x1
jax: 0.10.0
libtpu: 0.0.40
codegen_flags: <defaults>
</compile_context>

<pallas_src>
import jax
import jax.numpy as jnp
from jax.experimental import pallas as pl
from jax.experimental.pallas import tpu as pltpu


def rnn_kernel(x_ref, wxh_ref, whh_ref, who_ref, bh_ref, bo_ref,
               y_ref, hout_ref, buf_ref):
    """x_ref:   (seq*bs, vocab)  time-major rows (row = t*bs + b)
       wxh_ref: (vocab, h_dim)   whh_ref: (h_dim, h_dim)   who_ref: (h_dim, o_dim)
       bh_ref:  (1, h_dim)  == bxh + bhh (fused)            bo_ref: (1, o_dim)
       y_ref:   (seq*bs, o_dim)  hout_ref: (bs, h_dim)
       buf_ref: VMEM scratch (seq*bs, h_dim); holds XW, overwritten with H."""
    bs, h_dim = hout_ref.shape
    seq = x_ref.shape[0] // bs

    # ---- Phase 1: batched input projection — one big MXU matmul + fused bias.
    buf_ref[...] = (
        jnp.dot(x_ref[...], wxh_ref[...], preferred_element_type=jnp.float32)
        + bh_ref[...]
    )

    # ---- Phase 2: sequential recurrence (the only serialized work).
    #      H_t = XW_t + H_{t-1} @ Whh^T.  seq is small & static -> full unroll,
    #      which gives the scheduler complete visibility of the chain.
    whh = whh_ref[...]
    h = jnp.ones((bs, h_dim), dtype=jnp.float32)      # states = ones(bs, h_dim)
    for t in range(seq):
        rows = pl.ds(t * bs, bs)                       # static sublane-offset slice
        h = buf_ref[rows, :] + jnp.dot(h, whh, preferred_element_type=jnp.float32)
        buf_ref[rows, :] = h                           # overwrite XW_t with H_t

    # ---- Phase 3: batched output projection — one big MXU matmul, one store.
    # (o_dim < 128 makes this a single masked store; padding Who/bho to 128 lanes
    #  would un-mask it but adds a wrapper-side slice — not worth it at this size.)
    y_ref[...] = (
        jnp.dot(buf_ref[...], who_ref[...], preferred_element_type=jnp.float32)
        + bo_ref[...]
    ).astype(y_ref.dtype)

    # ---- Final hidden state, written exactly once.
    hout_ref[...] = h.astype(hout_ref.dtype)


def rnn_forward(X, params):
    """X: (bs, seq, vocab) f32.  Returns (Y: (bs, seq, o_dim), H: (bs, h_dim))."""
    wxh, bxh, whh, bhh, who, bho = params
    bs, seq, x_dim = X.shape
    h_dim = whh.shape[0]
    o_dim = who.shape[0]

    # Time-major 2-D slab (row = t*bs + b).  ~6.4 KB one-off copy; everything
    # downstream becomes dense slab matmuls and contiguous row-block slices.
    x2d = jnp.transpose(X, (1, 0, 2)).reshape(seq * bs, x_dim)

    # Pre-transpose Linear weights (out,in) -> (in,out); fuse the two H biases.
    wxh_t = wxh.T                                   # (vocab, h_dim)
    whh_t = whh.T                                   # (h_dim, h_dim)
    who_t = who.T                                   # (h_dim, o_dim)
    b_h = (bxh + bhh).reshape(1, h_dim)
    b_o = bho.reshape(1, o_dim)

    vmem = pl.BlockSpec(memory_space=pltpu.MemorySpace.VMEM)

    y2d, h_out = pl.pallas_call(
        rnn_kernel,
        out_shape=(
            jax.ShapeDtypeStruct((seq * bs, o_dim), jnp.float32),
            jax.ShapeDtypeStruct((bs, h_dim), jnp.float32),
        ),
        in_specs=[vmem] * 6,
        out_specs=(vmem, vmem),
        scratch_shapes=[pltpu.VMEM((seq * bs, h_dim), jnp.float32)],
        # No grid: single invocation, everything VMEM-resident.  For large bs one
        # would add a leading batch grid axis marked "parallel" (megacore).
    )(x2d, wxh_t, whh_t, who_t, b_h, b_o)

    Y = y2d.reshape(seq, bs, o_dim).transpose(1, 0, 2)   # back to (bs, seq, o_dim)
    return Y, h_out


def rnn_reference(X, params):
    wxh, bxh, whh, bhh, who, bho = params
    bs, seq, _ = X.shape
    h_dim = whh.shape[0]
    H = jnp.ones((bs, h_dim), jnp.float32)
    outs = []
    for t in range(seq):
        x = X[:, t, :]
        H = x @ wxh.T + bxh + H @ whh.T + bhh
        outs.append(H @ who.T + bho)
    Y = jnp.stack(outs, axis=1)
    return Y, H


def init_params(key, vocab_size, h_dim, o_dim):
    """nn.Linear-style params: weight (out, in), bias (out,)."""
    ks = jax.random.split(key, 6)

    def lin(kw, kb, in_f, out_f):
        bound = 1.0 / jnp.sqrt(in_f)
        w = jax.random.uniform(kw, (out_f, in_f), jnp.float32, -bound, bound)
        b = jax.random.uniform(kb, (out_f,), jnp.float32, -bound, bound)
        return w, b

    wxh, bxh = lin(ks[0], ks[1], vocab_size, h_dim)
    whh, bhh = lin(ks[2], ks[3], h_dim, h_dim)
    who, bho = lin(ks[4], ks[5], h_dim, o_dim)
    return (wxh, bxh, whh, bhh, who, bho)


if __name__ == "__main__":
    bs, seq = 2, 8
    vocab_size, h_dim, o_dim = 100, 32, 16

    key = jax.random.PRNGKey(0)
    kx, kp = jax.random.split(key)
    params = init_params(kp, vocab_size, h_dim, o_dim)
    # Original script uses X = torch.ones(...); perturb slightly to exercise math.
    X = jnp.ones((bs, seq, vocab_size), jnp.float32) \
        + 0.01 * jax.random.normal(kx, (bs, seq, vocab_size), jnp.float32)

    rnn_fwd = jax.jit(rnn_forward)
    Y, H = rnn_fwd(X, params)
    jax.block_until_ready((Y, H))

    Y_ref, H_ref = rnn_reference(X, params)
    assert Y.shape == (bs, seq, o_dim) and H.shape == (bs, h_dim)
    assert jnp.allclose(Y, Y_ref, rtol=1e-4, atol=1e-4)
    assert jnp.allclose(H, H_ref, rtol=1e-4, atol=1e-4)

    print("KERNEL_OK")
</pallas_src>

<mosaic_0001>
module attributes {stable_mosaic.version = 11 : i64} {
  func.func @rnn_kernel(%arg0: memref<16x100xf32, #tpu.memory_space<vmem>>, %arg1: memref<100x32xf32, #tpu.memory_space<vmem>>, %arg2: memref<32x32xf32, #tpu.memory_space<vmem>>, %arg3: memref<32x16xf32, #tpu.memory_space<vmem>>, %arg4: memref<1x32xf32, #tpu.memory_space<vmem>>, %arg5: memref<1x16xf32, #tpu.memory_space<vmem>>, %arg6: memref<16x16xf32, #tpu.memory_space<vmem>>, %arg7: memref<2x32xf32, #tpu.memory_space<vmem>>, %arg8: memref<16x32xf32, #tpu.memory_space<vmem>>) attributes {dimension_semantics = [], scalar_prefetch = 0 : i64, scratch_operands = 1 : i64, tpu.core_type = #tpu.core_type<tc>} {
    %c0 = arith.constant 0 : index
    %c0_0 = arith.constant 0 : index
    %0 = vector.load %arg0[%c0, %c0_0] : memref<16x100xf32, #tpu.memory_space<vmem>>, vector<16x100xf32>
    %c0_1 = arith.constant 0 : index
    %c0_2 = arith.constant 0 : index
    %1 = vector.load %arg1[%c0_1, %c0_2] : memref<100x32xf32, #tpu.memory_space<vmem>>, vector<100x32xf32>
    %cst = arith.constant dense<0.000000e+00> : vector<16x32xf32>
    %2 = tpu.matmul %0, %1, %cst {dimension_numbers = #tpu.dot_dimension_numbers<[1], [0], [0], [1], [0, 0, 1, 1], [], []>} : vector<16x100xf32>, vector<100x32xf32>, vector<16x32xf32> -> vector<16x32xf32>
    %c0_3 = arith.constant 0 : index
    %c0_4 = arith.constant 0 : index
    %3 = vector.load %arg4[%c0_3, %c0_4] : memref<1x32xf32, #tpu.memory_space<vmem>>, vector<1x32xf32>
    %4 = vector.broadcast %3 : vector<1x32xf32> to vector<16x32xf32>
    %5 = arith.addf %2, %4 : vector<16x32xf32>
    %c0_5 = arith.constant 0 : index
    %c0_6 = arith.constant 0 : index
    %6 = vector.load %arg8[%c0_5, %c0_6] : memref<16x32xf32, #tpu.memory_space<vmem>>, vector<16x32xf32>
    tpu.vector_store %arg8[%c0_5, %c0_6], %5 {strides = array<i32>} : memref<16x32xf32, #tpu.memory_space<vmem>>, vector<16x32xf32>,
    %c0_7 = arith.constant 0 : index
    %c0_8 = arith.constant 0 : index
    %7 = vector.load %arg2[%c0_7, %c0_8] : memref<32x32xf32, #tpu.memory_space<vmem>>, vector<32x32xf32>
    %cst_9 = arith.constant 1.000000e+00 : f32
    %8 = vector.broadcast %cst_9 : f32 to vector<2x32xf32>
    %c0_10 = arith.constant 0 : index
    %c0_11 = arith.constant 0 : index
    %9 = vector.load %arg8[%c0_10, %c0_11] : memref<16x32xf32, #tpu.memory_space<vmem>>, vector<2x32xf32>
    %cst_12 = arith.constant dense<0.000000e+00> : vector<2x32xf32>
    %10 = tpu.matmul %8, %7, %cst_12 {dimension_numbers = #tpu.dot_dimension_numbers<[1], [0], [0], [1], [0, 0, 1, 1], [], []>} : vector<2x32xf32>, vector<32x32xf32>, vector<2x32xf32> -> vector<2x32xf32>
    %11 = arith.addf %9, %10 : vector<2x32xf32>
    %c0_13 = arith.constant 0 : index
    %c0_14 = arith.constant 0 : index
    %12 = vector.load %arg8[%c0_13, %c0_14] : memref<16x32xf32, #tpu.memory_space<vmem>>, vector<2x32xf32>
    tpu.vector_store %arg8[%c0_13, %c0_14], %11 {strides = array<i32>} : memref<16x32xf32, #tpu.memory_space<vmem>>, vector<2x32xf32>,
    %c2 = arith.constant 2 : index
    %c0_15 = arith.constant 0 : index
    %13 = vector.load %arg8[%c2, %c0_15] : memref<16x32xf32, #tpu.memory_space<vmem>>, vector<2x32xf32>
    %cst_16 = arith.constant dense<0.000000e+00> : vector<2x32xf32>
    %14 = tpu.matmul %11, %7, %cst_16 {dimension_numbers = #tpu.dot_dimension_numbers<[1], [0], [0], [1], [0, 0, 1, 1], [], []>} : vector<2x32xf32>, vector<32x32xf32>, vector<2x32xf32> -> vector<2x32xf32>
    %15 = arith.addf %13, %14 : vector<2x32xf32>
    %c2_17 = arith.constant 2 : index
    %c0_18 = arith.constant 0 : index
    %16 = vector.load %arg8[%c2_17, %c0_18] : memref<16x32xf32, #tpu.memory_space<vmem>>, vector<2x32xf32>
    tpu.vector_store %arg8[%c2_17, %c0_18], %15 {strides = array<i32>} : memref<16x32xf32, #tpu.memory_space<vmem>>, vector<2x32xf32>,
    %c4 = arith.constant 4 : index
    %c0_19 = arith.constant 0 : index
    %17 = vector.load %arg8[%c4, %c0_19] : memref<16x32xf32, #tpu.memory_space<vmem>>, vector<2x32xf32>
    %cst_20 = arith.constant dense<0.000000e+00> : vector<2x32xf32>
    %18 = tpu.matmul %15, %7, %cst_20 {dimension_numbers = #tpu.dot_dimension_numbers<[1], [0], [0], [1], [0, 0, 1, 1], [], []>} : vector<2x32xf32>, vector<32x32xf32>, vector<2x32xf32> -> vector<2x32xf32>
    %19 = arith.addf %17, %18 : vector<2x32xf32>
    %c4_21 = arith.constant 4 : index
    %c0_22 = arith.constant 0 : index
    %20 = vector.load %arg8[%c4_21, %c0_22] : memref<16x32xf32, #tpu.memory_space<vmem>>, vector<2x32xf32>
    tpu.vector_store %arg8[%c4_21, %c0_22], %19 {strides = array<i32>} : memref<16x32xf32, #tpu.memory_space<vmem>>, vector<2x32xf32>,
    %c6 = arith.constant 6 : index
    %c0_23 = arith.constant 0 : index
    %21 = vector.load %arg8[%c6, %c0_23] : memref<16x32xf32, #tpu.memory_space<vmem>>, vector<2x32xf32>
    %cst_24 = arith.constant dense<0.000000e+00> : vector<2x32xf32>
    %22 = tpu.matmul %19, %7, %cst_24 {dimension_numbers = #tpu.dot_dimension_numbers<[1], [0], [0], [1], [0, 0, 1, 1], [], []>} : vector<2x32xf32>, vector<32x32xf32>, vector<2x32xf32> -> vector<2x32xf32>
    %23 = arith.addf %21, %22 : vector<2x32xf32>
    %c6_25 = arith.constant 6 : index
    %c0_26 = arith.constant 0 : index
    %24 = vector.load %arg8[%c6_25, %c0_26] : memref<16x32xf32, #tpu.memory_space<vmem>>, vector<2x32xf32>
    tpu.vector_store %arg8[%c6_25, %c0_26], %23 {strides = array<i32>} : memref<16x32xf32, #tpu.memory_space<vmem>>, vector<2x32xf32>,
    %c8 = arith.constant 8 : index
    %c0_27 = arith.constant 0 : index
    %25 = vector.load %arg8[%c8, %c0_27] : memref<16x32xf32, #tpu.memory_space<vmem>>, vector<2x32xf32>
    %cst_28 = arith.constant dense<0.000000e+00> : vector<2x32xf32>
    %26 = tpu.matmul %23, %7, %cst_28 {dimension_numbers = #tpu.dot_dimension_numbers<[1], [0], [0], [1], [0, 0, 1, 1], [], []>} : vector<2x32xf32>, vector<32x32xf32>, vector<2x32xf32> -> vector<2x32xf32>
    %27 = arith.addf %25, %26 : vector<2x32xf32>
    %c8_29 = arith.constant 8 : index
    %c0_30 = arith.constant 0 : index
    %28 = vector.load %arg8[%c8_29, %c0_30] : memref<16x32xf32, #tpu.memory_space<vmem>>, vector<2x32xf32>
    tpu.vector_store %arg8[%c8_29, %c0_30], %27 {strides = array<i32>} : memref<16x32xf32, #tpu.memory_space<vmem>>, vector<2x32xf32>,
    %c10 = arith.constant 10 : index
    %c0_31 = arith.constant 0 : index
    %29 = vector.load %arg8[%c10, %c0_31] : memref<16x32xf32, #tpu.memory_space<vmem>>, vector<2x32xf32>
    %cst_32 = arith.constant dense<0.000000e+00> : vector<2x32xf32>
    %30 = tpu.matmul %27, %7, %cst_32 {dimension_numbers = #tpu.dot_dimension_numbers<[1], [0], [0], [1], [0, 0, 1, 1], [], []>} : vector<2x32xf32>, vector<32x32xf32>, vector<2x32xf32> -> vector<2x32xf32>
    %31 = arith.addf %29, %30 : vector<2x32xf32>
    %c10_33 = arith.constant 10 : index
    %c0_34 = arith.constant 0 : index
    %32 = vector.load %arg8[%c10_33, %c0_34] : memref<16x32xf32, #tpu.memory_space<vmem>>, vector<2x32xf32>
    tpu.vector_store %arg8[%c10_33, %c0_34], %31 {strides = array<i32>} : memref<16x32xf32, #tpu.memory_space<vmem>>, vector<2x32xf32>,
    %c12 = arith.constant 12 : index
    %c0_35 = arith.constant 0 : index
    %33 = vector.load %arg8[%c12, %c0_35] : memref<16x32xf32, #tpu.memory_space<vmem>>, vector<2x32xf32>
    %cst_36 = arith.constant dense<0.000000e+00> : vector<2x32xf32>
    %34 = tpu.matmul %31, %7, %cst_36 {dimension_numbers = #tpu.dot_dimension_numbers<[1], [0], [0], [1], [0, 0, 1, 1], [], []>} : vector<2x32xf32>, vector<32x32xf32>, vector<2x32xf32> -> vector<2x32xf32>
    %35 = arith.addf %33, %34 : vector<2x32xf32>
    %c12_37 = arith.constant 12 : index
    %c0_38 = arith.constant 0 : index
    %36 = vector.load %arg8[%c12_37, %c0_38] : memref<16x32xf32, #tpu.memory_space<vmem>>, vector<2x32xf32>
    tpu.vector_store %arg8[%c12_37, %c0_38], %35 {strides = array<i32>} : memref<16x32xf32, #tpu.memory_space<vmem>>, vector<2x32xf32>,
    %c14 = arith.constant 14 : index
    %c0_39 = arith.constant 0 : index
    %37 = vector.load %arg8[%c14, %c0_39] : memref<16x32xf32, #tpu.memory_space<vmem>>, vector<2x32xf32>
    %cst_40 = arith.constant dense<0.000000e+00> : vector<2x32xf32>
    %38 = tpu.matmul %35, %7, %cst_40 {dimension_numbers = #tpu.dot_dimension_numbers<[1], [0], [0], [1], [0, 0, 1, 1], [], []>} : vector<2x32xf32>, vector<32x32xf32>, vector<2x32xf32> -> vector<2x32xf32>
    %39 = arith.addf %37, %38 : vector<2x32xf32>
    %c14_41 = arith.constant 14 : index
    %c0_42 = arith.constant 0 : index
    %40 = vector.load %arg8[%c14_41, %c0_42] : memref<16x32xf32, #tpu.memory_space<vmem>>, vector<2x32xf32>
    tpu.vector_store %arg8[%c14_41, %c0_42], %39 {strides = array<i32>} : memref<16x32xf32, #tpu.memory_space<vmem>>, vector<2x32xf32>,
    %c0_43 = arith.constant 0 : index
    %c0_44 = arith.constant 0 : index
    %41 = vector.load %arg8[%c0_43, %c0_44] : memref<16x32xf32, #tpu.memory_space<vmem>>, vector<16x32xf32>
    %c0_45 = arith.constant 0 : index
    %c0_46 = arith.constant 0 : index
    %42 = vector.load %arg3[%c0_45, %c0_46] : memref<32x16xf32, #tpu.memory_space<vmem>>, vector<32x16xf32>
    %cst_47 = arith.constant dense<0.000000e+00> : vector<16x16xf32>
    %43 = tpu.matmul %41, %42, %cst_47 {dimension_numbers = #tpu.dot_dimension_numbers<[1], [0], [0], [1], [0, 0, 1, 1], [], []>} : vector<16x32xf32>, vector<32x16xf32>, vector<16x16xf32> -> vector<16x16xf32>
    %c0_48 = arith.constant 0 : index
    %c0_49 = arith.constant 0 : index
    %44 = vector.load %arg5[%c0_48, %c0_49] : memref<1x16xf32, #tpu.memory_space<vmem>>, vector<1x16xf32>
    %45 = vector.broadcast %44 : vector<1x16xf32> to vector<16x16xf32>
    %46 = arith.addf %43, %45 : vector<16x16xf32>
    %c0_50 = arith.constant 0 : index
    %c0_51 = arith.constant 0 : index
    %47 = vector.load %arg6[%c0_50, %c0_51] : memref<16x16xf32, #tpu.memory_space<vmem>>, vector<16x16xf32>
    tpu.vector_store %arg6[%c0_50, %c0_51], %46 {strides = array<i32>} : memref<16x16xf32, #tpu.memory_space<vmem>>, vector<16x16xf32>,
    %c0_52 = arith.constant 0 : index
    %c0_53 = arith.constant 0 : index
    %48 = vector.load %arg7[%c0_52, %c0_53] : memref<2x32xf32, #tpu.memory_space<vmem>>, vector<2x32xf32>
    tpu.vector_store %arg7[%c0_52, %c0_53], %39 {strides = array<i32>} : memref<2x32xf32, #tpu.memory_space<vmem>>, vector<2x32xf32>,
    return
  }
}

</mosaic_0001>

<bundles_post_ra>
// kernel: rnn_forward.1
= control target key start
LH: loop header
LB: loop body
LE: loop exit
PB: predicated region body
PF: predicated region fallthrough
CT: control target
= control target key end

     0   :  { %vm55_vm0 = vcmask 1043456   ;;  %vm48_vm1 = vcmask 818176   ;;  %v1096_v3 = vmov 0.0   ;;  %vm1097_vm2 = vmmov 0   ;;  %s1335_s0 = inlined_call_operand.vmem [shape: f32[16,100], index: 0, kind: input, shape index: {}]   ;;  %s1336_s1 = inlined_call_operand.vmem [shape: f32[100,32], index: 1, kind: input, shape index: {}]   ;;  %s1337_s2 = inlined_call_operand.vmem [shape: f32[32,32], index: 2, kind: input, shape index: {}]   ;;  %s1338_s3 = inlined_call_operand.vmem [shape: f32[32,16], index: 3, kind: input, shape index: {}]   ;;  %s1339_s4 = inlined_call_operand.vmem [shape: f32[1,32], index: 4, kind: input, shape index: {}]   ;;  %s1340_s5 = inlined_call_operand.vmem [shape: f32[1,16], index: 5, kind: input, shape index: {}]   ;;  %s1341_s6 = inlined_call_operand.vmem [shape: f32[16,16], index: 6, kind: output, shape index: {0}]   ;;  %s1342_s7 = inlined_call_operand.hbm [shape: f32[2,32], index: 7, kind: output, shape index: {1}]  }
   0x1   :  { %v40_v0 = vld [vmem:[%s1336_s1 + $0x60] sm:$0xf]  ;;  %v39_v1 = vld [vmem:[%s1336_s1 + $0x58] sm:$0xff]  ;;  %v38_v2 = vld [vmem:[%s1336_s1 + $0x50] sm:$0xff]  ;;  %971 = vmatprep.subr.mxu1 %v1096_v3  ;;  %979 = vmatprep.mubr.msk.f32.mxu1 %vm1097_vm2, %v1096_v3 }
   0x2   :  { %942 = vmatprep.subr.msk.mxu0 %vm55_vm0, %v40_v0  ;;  %v37_v4 = vld [vmem:[%s1336_s1 + $0x48] sm:$0xff]  ;;  %v26_v5 = vld [vmem:[%s1335_s0] sm:$0xff]  ;;  %v1162_v6 = vld [vmem:[%s1337_s2 + $0x18] sm:$0xff] }
   0x3   :  { %943 = vmatpush3.msk.msra.mxu0 %vm55_vm0, %v40_v0  ;;  %968 = vmatprep.mubr.msk.f32.mxu0 %vm48_vm1, %v26_v5  ;;  %v1167_v7 = vld [vmem:[%s1337_s2 + $0x10] sm:$0xff]  ;;  %v36_v8 = vld [vmem:[%s1336_s1 + $0x40] sm:$0xff] }
   0x4   :  { %944 = vmatprep.subr.mxu0 %v39_v1  ;;  %972 = vmatpush3.msra.mxu1 %v1162_v6 }
   0x5   :  { %945 = vmatpush3.msra.mxu0 %v39_v1 }
   0x6   :  { %946 = vmatprep.subr.mxu0 %v38_v2 }
   0x7   :  { %947 = vmatpush3.msra.mxu0 %v38_v2 }
   0x8   :  { %13 = vsyncpa [#allocation4], 0  ;;  %948 = vmatprep.subr.mxu0 %v37_v4  ;;  %973 = vmatprep.subr.mxu1 %v1096_v3  ;;  %v1177_v9 = vld [vmem:[%s1337_s2 + $0x8] sm:$0xff]  ;;  %v35_v10 = vld [vmem:[%s1336_s1 + $0x38] sm:$0xff]  ;;  %vm134_vm3 = vcmask 261120   ;;  %v1098_v14 = vmov 1.0  }
   0x9   :  { %949 = vmatpush3.msra.mxu0 %v37_v4  ;;  %974 = vmatpush3.msra.mxu1 %v1167_v7  ;;  %v1187_v11 = vld [vmem:[%s1337_s2] sm:$0xff]  ;;  %v34_v12 = vld [vmem:[%s1336_s1 + $0x30] sm:$0xff]  ;;  %v33_v13 = vld [vmem:[%s1336_s1 + $0x28] sm:$0xff]  ;;  %vm216_vm4 = vcmask 254976   ;;  %s1099_s22 = smov [#allocation3]  }
   0xa   :  { %950 = vmatprep.subr.mxu0 %v36_v8  ;;  %975 = vmatprep.subr.mxu1 %v1096_v3  ;;  %v32_v15 = vld [vmem:[%s1336_s1 + $0x20] sm:$0xff]  ;;  %v31_v16 = vld [vmem:[%s1336_s1 + $0x18] sm:$0xff]  ;;  %v30_v17 = vld [vmem:[%s1336_s1 + $0x10] sm:$0xff]  ;;  %s856_s23 = sshll.u32 %s1099_s22, 4  ;;  %s857_s23 = int_to_ptr.vmem [resolvable:$true] %s856_s23 }
   0xb   :  { %951 = vmatpush3.msra.mxu0 %v36_v8  ;;  %976 = vmatpush3.msra.mxu1 %v1177_v9  ;;  %v29_v18 = vld [vmem:[%s1336_s1 + $0x8] sm:$0xff]  ;;  %v28_v19 = vld [vmem:[%s1336_s1] sm:$0xff]  ;;  %v755_v55 = vld [vmem:[%s1338_s3 + $0x18] sm:$0xff]  ;;  %s1074_s24 = scalar_lea.vmem %s857_s23, 32  ;;  %p1079_p1 = scmp.lt.s32.totalorder %s857_s23, %s857_s23 }
   0xc   :  { %952 = vmatprep.subr.mxu0 %v35_v10  ;;  %977 = vmatprep.subr.mxu1 %v1096_v3  ;;  %v27_v20 = vld [vmem:[%s1335_s0 + $0x8] sm:$0xff]  ;;  %v866_v23 = vld [vmem:[%s1339_s4] ss:$0 sm:$0xff]  ;;  %v754_v56 = vld [vmem:[%s1338_s3 + $0x10] sm:$0xff]  ;;  %p1075_p0 = scmp.ne.s32.totalorder %s857_s23, %s1074_s24  ;;  %p1080_p2 = scmp.lt.s32.totalorder %s1074_s24, %s1074_s24 }
   0xd   :  { %953 = vmatpush3.msra.mxu0 %v35_v10  ;;  %978 = vmatpush3.msra.mxu1 %v1187_v11  ;;  %v753_v57 = vld [vmem:[%s1338_s3 + $0x8] sm:$0xff]  ;;  %v752_v58 = vld [vmem:[%s1338_s3] sm:$0xff] }
   0xe   :  { %954 = vmatprep.subr.mxu0 %v34_v12  ;;  %980 = vmatmul.mubr.msk.f32.vlgmr.msra.gmra.mxu1 %vm134_vm3, %v1098_v14  ;;  %p1081_p3 = por %p1080_p2, %p1079_p1 }
   0xf   :  { %955 = vmatpush3.msra.mxu0 %v34_v12  ;;  %982 = vmatprep.subr.mxu1 %v1096_v3 }
  0x10   :  { %956 = vmatprep.subr.mxu0 %v33_v13  ;;  %983 = vmatpush3.msra.mxu1 %v1162_v6  ;;  %p1082_p4 = pnand %p1081_p3, %p1075_p0 }
  0x11   :  { %957 = vmatpush3.msra.mxu0 %v33_v13  ;;  %984 = vmatprep.subr.mxu1 %v1096_v3 }
  0x12   :  { %958 = vmatprep.subr.mxu0 %v32_v15  ;;  %985 = vmatpush3.msra.mxu1 %v1167_v7 }
  0x13   :  { %959 = vmatpush3.msra.mxu0 %v32_v15  ;;  %986 = vmatprep.subr.mxu1 %v1096_v3 }
  0x14   :  { %960 = vmatprep.subr.mxu0 %v31_v16  ;;  %987 = vmatpush3.msra.mxu1 %v1177_v9 }
  0x15   :  { %961 = vmatpush3.msra.mxu0 %v31_v16  ;;  %988 = vmatprep.subr.mxu1 %v1096_v3 }
  0x16   :  { %962 = vmatprep.subr.mxu0 %v30_v17  ;;  %989 = vmatpush3.msra.mxu1 %v1187_v11 }
  0x17   :  { %963 = vmatpush3.msra.mxu0 %v30_v17  ;;  %990 = vmatprep.mubr.msk.f32.mxu1 %vm1097_vm2, %v1096_v3 }
  0x18   :  { %964 = vmatprep.subr.mxu0 %v29_v18  ;;  %993 = vmatprep.subr.mxu1 %v1096_v3 }
  0x19   :  { %965 = vmatpush3.msra.mxu0 %v29_v18 }
  0x1a   :  { %966 = vmatprep.subr.mxu0 %v28_v19 }
  0x1b   :  { %967 = vmatpush3.msra.mxu0 %v28_v19 }
  0x1c   :  { %969 = vmatmul.mubr.msk.f32.vlgmr.msra.gmra.mxu0 %vm48_vm1, %v27_v20  ;;  %1015 = vmatprep.subr.mxu0 %v1096_v3 }
  0x1d   :  { %1016 = vmatpush3.msra.mxu0 %v1162_v6  ;;  %1023 = vmatprep.mubr.msk.f32.mxu0 %vm1097_vm2, %v1096_v3 }
  0x1e   :  { %1017 = vmatprep.subr.mxu0 %v1096_v3 }
  0x1f   :  { %1018 = vmatpush3.msra.mxu0 %v1167_v7 }
  0x20   :  { %1019 = vmatprep.subr.mxu0 %v1096_v3 }
  0x21   :  { %1020 = vmatpush3.msra.mxu0 %v1177_v9 }
  0x22   :  { %1021 = vmatprep.subr.mxu0 %v1096_v3 }
  0x23   :  { %1022 = vmatpush3.msra.mxu0 %v1187_v11 }
  0x24   :  { %1037 = vmatprep.subr.mxu0 %v1096_v3 }
  0xce   :  { %v211_v21 = vpop.f32.mrf.mxu1 }
  0xd0   :  { %v981_v22 = vpop.f32.mrf.mxu1 }
  0xdc   :  { %v970_v24 = vpop.f32.mrf.mxu0 }
  0xdd   :  { %v131_v25 = vadd.f32 %v970_v24, %v866_v23 }
  0xde   :  { %v125_v26 = vpop.f32.mrf.mxu0 }
  0xdf   :  { %136 = vst.msk [vmem:[#allocation2 + $0x8] sm:$0xff] %vm134_vm3, %v131_v25  ;;  %v126_v27 = vadd.f32 %v866_v23, %v125_v26 }
  0xe1   :  { %135 = vst.msk [vmem:[#allocation2] sm:$0xff] %vm134_vm3, %v126_v27 }
  0xe6   :  { %v446_v42 = vld [vmem:[#allocation2 + $0x8] sm:$0x3]  ;;  %v522_v46 = vld [vmem:[#allocation2 + $0xa] sm:$0x3]  ;;  %v598_v51 = vld [vmem:[#allocation2 + $0xc] sm:$0x3] }
  0xe7   :  { %v674_v59 = vld [vmem:[#allocation2 + $0xe] sm:$0x3] }
  0xe8   :  { %v141_v28 = vld [vmem:[#allocation2] sm:$0x3]  ;;  %v218_v30 = vld [vmem:[#allocation2 + $0x2] sm:$0x3]  ;;  %v294_v34 = vld [vmem:[#allocation2 + $0x4] sm:$0x3] }
  0xe9   :  { %v215_v29 = vadd.f32 %v211_v21, %v141_v28  ;;  %v370_v38 = vld [vmem:[#allocation2 + $0x6] sm:$0x3] }
  0xeb   :  { %217 = vst.msk [vmem:[#allocation2] sm:$0x3] %vm216_vm4, %v215_v29  ;;  %991 = vmatmul.mubr.msk.f32.vlgmr.msra.gmra.mxu1 %vm134_vm3, %v215_v29 }
  0xec   :  { %994 = vmatpush3.msra.mxu1 %v1162_v6  ;;  %1001 = vmatprep.mubr.msk.f32.mxu1 %vm1097_vm2, %v1096_v3 }
  0xed   :  { %995 = vmatprep.subr.mxu1 %v1096_v3 }
  0xee   :  { %996 = vmatpush3.msra.mxu1 %v1167_v7 }
  0xef   :  { %997 = vmatprep.subr.mxu1 %v1096_v3 }
  0xf0   :  { %998 = vmatpush3.msra.mxu1 %v1177_v9 }
  0xf1   :  { %999 = vmatprep.subr.mxu1 %v1096_v3 }
  0xf2   :  { %1000 = vmatpush3.msra.mxu1 %v1187_v11 }
  0xf3   :  { %1004 = vmatprep.subr.mxu1 %v1096_v3 }
 0x1ab   :  { %v288_v31 = vpop.f32.mrf.mxu1 }
 0x1ac   :  { %v292_v32 = vadd.f32 %v288_v31, %v218_v30 }
 0x1ad   :  { %v992_v33 = vpop.f32.mrf.mxu1 }
 0x1ae   :  { %293 = vst.msk [vmem:[#allocation2 + $0x2] sm:$0x3] %vm216_vm4, %v292_v32  ;;  %1002 = vmatmul.mubr.msk.f32.vlgmr.msra.gmra.mxu1 %vm134_vm3, %v292_v32 }
 0x1af   :  { %1005 = vmatpush3.msra.mxu1 %v1162_v6  ;;  %1012 = vmatprep.mubr.msk.f32.mxu1 %vm1097_vm2, %v1096_v3 }
 0x1b0   :  { %1006 = vmatprep.subr.mxu1 %v1096_v3 }
 0x1b1   :  { %1007 = vmatpush3.msra.mxu1 %v1167_v7 }
 0x1b2   :  { %1008 = vmatprep.subr.mxu1 %v1096_v3 }
 0x1b3   :  { %1009 = vmatpush3.msra.mxu1 %v1177_v9 }
 0x1b4   :  { %1010 = vmatprep.subr.mxu1 %v1096_v3 }
 0x1b5   :  { %1011 = vmatpush3.msra.mxu1 %v1187_v11 }
 0x1b6   :  { %1026 = vmatprep.subr.mxu1 %v1096_v3 }
 0x26e   :  { %v364_v35 = vpop.f32.mrf.mxu1 }
 0x26f   :  { %v368_v36 = vadd.f32 %v364_v35, %v294_v34 }
 0x270   :  { %v1003_v37 = vpop.f32.mrf.mxu1 }
 0x271   :  { %369 = vst.msk [vmem:[#allocation2 + $0x4] sm:$0x3] %vm216_vm4, %v368_v36  ;;  %1013 = vmatmul.mubr.msk.f32.vlgmr.msra.gmra.mxu1 %vm134_vm3, %v368_v36 }
 0x272   :  { %1027 = vmatpush3.msra.mxu1 %v1162_v6  ;;  %1034 = vmatprep.mubr.msk.f32.mxu1 %vm1097_vm2, %v1096_v3 }
 0x273   :  { %1028 = vmatprep.subr.mxu1 %v1096_v3 }
 0x274   :  { %1029 = vmatpush3.msra.mxu1 %v1167_v7 }
 0x275   :  { %1030 = vmatprep.subr.mxu1 %v1096_v3 }
 0x276   :  { %1031 = vmatpush3.msra.mxu1 %v1177_v9 }
 0x277   :  { %1032 = vmatprep.subr.mxu1 %v1096_v3 }
 0x278   :  { %1033 = vmatpush3.msra.mxu1 %v1187_v11 }
 0x279   :  { %1048 = vmatprep.subr.mxu1 %v1096_v3 }
 0x331   :  { %v440_v39 = vpop.f32.mrf.mxu1 }
 0x332   :  { %v444_v40 = vadd.f32 %v440_v39, %v370_v38 }
 0x333   :  { %v1014_v41 = vpop.f32.mrf.mxu1 }
 0x334   :  { %445 = vst.msk [vmem:[#allocation2 + $0x6] sm:$0x3] %vm216_vm4, %v444_v40  ;;  %1024 = vmatmul.mubr.msk.f32.vlgmr.msra.gmra.mxu0 %vm134_vm3, %v444_v40 }
 0x335   :  { %1038 = vmatpush3.msra.mxu0 %v1162_v6  ;;  %1045 = vmatprep.mubr.msk.f32.mxu0 %vm1097_vm2, %v1096_v3 }
 0x336   :  { %1039 = vmatprep.subr.mxu0 %v1096_v3 }
 0x337   :  { %1040 = vmatpush3.msra.mxu0 %v1167_v7 }
 0x338   :  { %1041 = vmatprep.subr.mxu0 %v1096_v3 }
 0x339   :  { %1042 = vmatpush3.msra.mxu0 %v1177_v9 }
 0x33a   :  { %1043 = vmatprep.subr.mxu0 %v1096_v3 }
 0x33b   :  { %1044 = vmatpush3.msra.mxu0 %v1187_v11  ;;  %v750_v50 = vld [vmem:[#allocation2] sm:$0xff] }
 0x33c   :  { %1059 = vmatprep.subr.mxu0 %v755_v55 }
 0x3f4   :  { %v516_v43 = vpop.f32.mrf.mxu0 }
 0x3f5   :  { %v520_v44 = vadd.f32 %v516_v43, %v446_v42 }
 0x3f6   :  { %v1025_v45 = vpop.f32.mrf.mxu0 }
 0x3f7   :  { %521 = vst.msk [vmem:[#allocation2 + $0x8] sm:$0x3] %vm216_vm4, %v520_v44  ;;  %1035 = vmatmul.mubr.msk.f32.vlgmr.msra.gmra.mxu1 %vm134_vm3, %v520_v44 }
 0x3f8   :  { %1049 = vmatpush3.msra.mxu1 %v1162_v6  ;;  %1056 = vmatprep.mubr.msk.f32.mxu1 %vm1097_vm2, %v1096_v3 }
 0x3f9   :  { %1050 = vmatprep.subr.mxu1 %v1096_v3 }
 0x3fa   :  { %1051 = vmatpush3.msra.mxu1 %v1167_v7 }
 0x3fb   :  { %1052 = vmatprep.subr.mxu1 %v1096_v3 }
 0x3fc   :  { %1053 = vmatpush3.msra.mxu1 %v1177_v9 }
 0x3fd   :  { %1054 = vmatprep.subr.mxu1 %v1096_v3 }
 0x3fe   :  { %1055 = vmatpush3.msra.mxu1 %v1187_v11 }
 0x4b7   :  { %v592_v47 = vpop.f32.mrf.mxu1 }
 0x4b8   :  { %v596_v48 = vadd.f32 %v592_v47, %v522_v46 }
 0x4b9   :  { %v1036_v49 = vpop.f32.mrf.mxu1 }
 0x4ba   :  { %597 = vst.msk [vmem:[#allocation2 + $0xa] sm:$0x3] %vm216_vm4, %v596_v48  ;;  %1046 = vmatmul.mubr.msk.f32.vlgmr.msra.gmra.mxu0 %vm134_vm3, %v596_v48 }
 0x4bb   :  { %1067 = vmatprep.mubr.msk.f32.mxu0 %vm134_vm3, %v750_v50  ;;  %1060 = vmatpush3.msra.mxu0 %v755_v55 }
 0x4bc   :  { %1061 = vmatprep.subr.mxu0 %v754_v56 }
 0x4bd   :  { %1062 = vmatpush3.msra.mxu0 %v754_v56 }
 0x4be   :  { %1063 = vmatprep.subr.mxu0 %v753_v57 }
 0x4bf   :  { %1064 = vmatpush3.msra.mxu0 %v753_v57 }
 0x4c0   :  { %1065 = vmatprep.subr.mxu0 %v752_v58 }
 0x4c1   :  { %1066 = vmatpush3.msra.mxu0 %v752_v58 }
 0x57a   :  { %v668_v52 = vpop.f32.mrf.mxu0 }
 0x57b   :  { %v672_v53 = vadd.f32 %v668_v52, %v598_v51 }
 0x57c   :  { %v1047_v54 = vpop.f32.mrf.mxu0 }
 0x57d   :  { %673 = vst.msk [vmem:[#allocation2 + $0xc] sm:$0x3] %vm216_vm4, %v672_v53  ;;  %1057 = vmatmul.mubr.msk.f32.vlgmr.msra.gmra.mxu1 %vm134_vm3, %v672_v53 }
 0x63d   :  { %v744_v60 = vpop.f32.mrf.mxu1 }
 0x63e   :  { %v748_v61 = vadd.f32 %v744_v60, %v674_v59 }
 0x63f   :  { %v1058_v62 = vpop.f32.mrf.mxu1 }
 0x640   :  { %749 = vst.msk [vmem:[#allocation2 + $0xe] sm:$0x3] %vm216_vm4, %v748_v61  ;;  %847 = vst.msk [vmem:[#allocation3] sm:$0x3] %vm216_vm4, %v748_v61 }
 0x647   :  { %v751_v63 = vld [vmem:[#allocation2 + $0x8] sm:$0xff] }
 0x648   :  { %1068 = vmatmul.mubr.msk.f32.vlgmr.msra.gmra.mxu0 %vm134_vm3, %v751_v63 }
 0x649   :  { %1085 = shalt.err (!%p1082_p4)
}
 0x64a   :  { %859 = dma.vmem_to_hbm [thread:$0]  %s857_s23, 32, %s1342_s7, [#allocation4]   ;;  %v878_v0 = vld [vmem:[%s1340_s5] ss:$0 sm:$0xff]  ;;  %vm844_vm5 = vcmask 130048  }
 0x708   :  { %v1069_v1 = vpop.f32.mrf.mxu0 }
 0x709   :  { %v841_v2 = vadd.f32 %v1069_v1, %v878_v0 }
 0x70a   :  { %v835_v3 = vpop.f32.mrf.mxu0 }
 0x70b   :  { %846 = vst.msk [vmem:[%s1341_s6 + $0x8] sm:$0xff] %vm844_vm5, %v841_v2  ;;  %v836_v4 = vadd.f32 %v878_v0, %v835_v3 }
 0x70d   :  { %845 = vst.msk [vmem:[%s1341_s6] sm:$0xff] %vm844_vm5, %v836_v4 }
 0x70e   :  { %1094 = dma.done.wait [#allocation4], 32  }
 0x70f   :  { %1095 = vsyncadd [#allocation4], 4294967264 }
 0x710   :  { %865 = vsyncpa [#allocation4], 1 }

</bundles_post_ra>
